<compile_context>
chip_gen: v7x
topology: tpu7x:2x2x1
jax: 0.10.0
libtpu: 0.0.40
codegen_flags: <defaults>
</compile_context>

<pallas_src>
import jax
import jax.numpy as jnp
from jax.experimental import pallas as pl
from jax.experimental.pallas import tpu as pltpu

EPS = 1e-5
MiB = 1024 * 1024


def _round_up(x, m):
    return ((x + m - 1) // m) * m


def _vmem_capacity_bytes():
    try:
        return int(pltpu.get_tpu_info().vmem_capacity_bytes)
    except Exception:
        return 64 * MiB  # conservative fallback: v7x per-TensorCore VMEM


def _spec(shape, imap, mode=None):
    if mode is None:
        return pl.BlockSpec(shape, imap)
    return pl.BlockSpec(shape, imap, pipeline_mode=mode)


def prenorm_linear_kernel(x_ref, gamma_ref, beta_ref, w_ref, b_ref, o_ref, y_ref):
    """One (tr, tc) output tile of (LayerNorm(x) @ W + b).

    Grid: (row_tiles, col_tiles), column axis innermost.  LayerNorm of the
    current row tile is computed once (at column tile 0): reductions in f32,
    a single cast to the bf16 MXU dtype, cached in the y_ref VMEM scratch so
    it is reused for every column tile of W.
    """
    @pl.when(pl.program_id(1) == 0)
    def _():
        x = x_ref[...].astype(jnp.float32)
        mean = jnp.mean(x, axis=-1, keepdims=True)
        xc = x - mean
        var = jnp.mean(xc * xc, axis=-1, keepdims=True)   # biased, matches torch
        inv = jax.lax.rsqrt(var + EPS)                     # EUP slot (free-ish)
        y = xc * inv * gamma_ref[...] + beta_ref[...]
        y_ref[...] = y.astype(y_ref.dtype)                 # single cast to bf16
        # TODO(synk): on v7x, overlap this LN with the previous row tile's
        # column matmuls (2-deep y scratch + manual x prefetch) to fully hide
        # the serialized VPU work behind the MXU.

    # bf16 x bf16 -> f32 accumulation on the MXU.
    acc = jnp.dot(y_ref[...], w_ref[...], preferred_element_type=jnp.float32)
    acc = acc + b_ref[...]
    o_ref[...] = acc.astype(o_ref.dtype)


def prenorm_linear(x, gamma, beta, w, b, *, tile_rows=512, tile_cols=None,
                   compute_dtype=jnp.bfloat16, io_dtype=jnp.bfloat16,
                   out_dtype=None):
    """PreNorm with fn=Linear(D, D): x:[B,N,D] -> LayerNorm_D(x) @ W + b.

    x and the output cross the kernel boundary in `io_dtype` (bf16 by default
    to cut HBM bytes; pass io_dtype=out_dtype=jnp.float32 for f32-sensitive
    callers).  LayerNorm statistics are always computed in f32.
    """
    B, N, D = x.shape
    assert w.shape == (D, D) and gamma.shape == (D,)
    assert beta.shape == (D,) and b.shape == (D,)

    if out_dtype is None:
        out_dtype = io_dtype

    rows = B * N
    io_bytes = jnp.dtype(io_dtype).itemsize
    out_bytes = jnp.dtype(out_dtype).itemsize
    w_bytes = jnp.dtype(compute_dtype).itemsize
    y_bytes = jnp.dtype(compute_dtype).itemsize

    # Generation-aware VMEM budget (~100 MiB on 128 MiB parts, ~52 MiB on v7x).
    vmem_cap = _vmem_capacity_bytes()
    vmem_limit = int(min(vmem_cap - 12 * MiB, 100 * MiB))

    # --- row tile: multiple of 16 (bf16 packs 16 rows per vreg) --------------
    tr = _round_up(min(tile_rows, _round_up(rows, 16)), 16)

    def vmem_use(tr_, tc_, resident_w_):
        w_buf = (1 if resident_w_ else 2) * D * tc_ * w_bytes
        x_buf = 2 * tr_ * D * io_bytes            # double-buffered input tile
        y_buf = tr_ * D * y_bytes                 # LN cache scratch
        o_buf = 2 * tr_ * tc_ * out_bytes         # double-buffered output tile
        params = 4 * D * 4                        # gamma/beta/bias (f32)
        return w_buf + x_buf + y_buf + o_buf + params + 1 * MiB  # slack

    # --- column tiling of W ---------------------------------------------------
    resident_w = ((tile_cols is None or tile_cols == D)
                  and vmem_use(tr, D, True) <= vmem_limit)
    col_pad = 0
    if resident_w:
        tc = D
    else:
        if (tile_cols is not None and tile_cols != D
                and D % tile_cols == 0 and tile_cols % 128 == 0):
            tc = tile_cols
        else:
            budget = max(0, vmem_limit - vmem_use(tr, 0, False))
            per_col = 2 * (D * w_bytes + tr * out_bytes)
            max_tc = max(128, (budget // per_col) // 128 * 128)
            tc = None
            for cand in range(min(max_tc, (D // 128) * 128), 127, -128):
                if D % cand == 0:
                    tc = cand
                    break
            if tc is None:
                # No multiple-of-128 divisor: pad W's columns (never tc = D).
                tc = min(max_tc, 512)
                col_pad = _round_up(D, tc) - D
        # Col-tiled path re-streams W once per row tile: bigger tr on 128 MiB
        # parts halves that traffic.
        if vmem_cap >= 128 * MiB:
            while tr < 1024 and rows > tr and vmem_use(2 * tr, tc, False) <= vmem_limit:
                tr *= 2

    # v7x megacore: make sure the "parallel" row axis has >= 2 tiles.
    padded_rows = _round_up(rows, tr)
    while padded_rows // tr < 2 and tr > 256:
        tr = max(256, _round_up(tr // 2, 16))
        padded_rows = _round_up(rows, tr)

    # --- operands -------------------------------------------------------------
    x2 = x.reshape(rows, D).astype(io_dtype)     # bf16 across the DMA boundary
    if padded_rows != rows:
        x2 = jnp.pad(x2, ((0, padded_rows - rows), (0, 0)))

    w_c = w.astype(compute_dtype)                # one-time cast, not per step
    b2 = b.reshape(1, D).astype(jnp.float32)
    Dp = D + col_pad
    if col_pad:
        w_c = jnp.pad(w_c, ((0, 0), (0, col_pad)))
        b2 = jnp.pad(b2, ((0, 0), (0, col_pad)))
    gamma2 = gamma.reshape(1, D).astype(jnp.float32)
    beta2 = beta.reshape(1, D).astype(jnp.float32)

    single = pl.Buffered(1)
    w_mode = single if resident_w else None      # double-buffer W col tiles
    b_mode = single if resident_w else None

    grid = (padded_rows // tr, Dp // tc)

    out = pl.pallas_call(
        prenorm_linear_kernel,
        out_shape=jax.ShapeDtypeStruct((padded_rows, Dp), out_dtype),
        grid_spec=pltpu.PrefetchScalarGridSpec(
            num_scalar_prefetch=0,
            grid=grid,
            in_specs=[
                # x row tile: block index constant across j -> fetched once
                # per row tile; double-buffered so tile i+1 prefetches under
                # tile i's column loop.
                _spec((tr, D), lambda i, j: (i, 0)),
                # Invariant (1, D) LayerNorm params: single-buffered.
                _spec((1, D), lambda i, j: (0, 0), single),
                _spec((1, D), lambda i, j: (0, 0), single),
                # Weight: whole & single-buffered, or column-tiled.
                _spec((D, tc), lambda i, j: (0, j), w_mode),
                # Bias column tile.
                _spec((1, tc), lambda i, j: (0, j), b_mode),
            ],
            out_specs=pl.BlockSpec((tr, tc), lambda i, j: (i, j)),
            scratch_shapes=[pltpu.VMEM((tr, D), compute_dtype)],  # cached LN(x)
        ),
        compiler_params=pltpu.CompilerParams(
            # Row tiles independent; column axis reuses the y scratch, so it
            # must stay sequential on one core.
            dimension_semantics=("parallel", "arbitrary"),
            vmem_limit_bytes=vmem_limit,
        ),
    )(x2, gamma2, beta2, w_c, b2)

    return out[:rows, :D].reshape(B, N, D)


def prenorm_linear_ref(x, gamma, beta, w, b, compute_dtype=jnp.bfloat16,
                       io_dtype=jnp.bfloat16, out_dtype=None):
    if out_dtype is None:
        out_dtype = io_dtype
    xf = x.astype(io_dtype).astype(jnp.float32)
    mean = jnp.mean(xf, axis=-1, keepdims=True)
    var = jnp.mean((xf - mean) ** 2, axis=-1, keepdims=True)
    y = (xf - mean) * jax.lax.rsqrt(var + EPS) * gamma + beta
    out = jnp.dot(y.astype(compute_dtype), w.astype(compute_dtype),
                  preferred_element_type=jnp.float32) + b.astype(jnp.float32)
    return out.astype(out_dtype)


if __name__ == "__main__":
    B, N, D = 2, 8, 32
    key = jax.random.PRNGKey(0)
    kx, kg, kb, kw, kbias = jax.random.split(key, 5)

    x = jax.random.normal(kx, (B, N, D), dtype=jnp.float32)
    # nn.LayerNorm defaults to gamma=1, beta=0; perturb deterministically so
    # the affine path is actually exercised.
    gamma = 1.0 + 0.1 * jax.random.normal(kg, (D,), dtype=jnp.float32)
    beta = 0.1 * jax.random.normal(kb, (D,), dtype=jnp.float32)
    w = jax.random.normal(kw, (D, D), dtype=jnp.float32) / jnp.sqrt(D)
    b = 0.1 * jax.random.normal(kbias, (D,), dtype=jnp.float32)

    out = prenorm_linear(x, gamma, beta, w, b)
    out = jax.block_until_ready(out)

    ref = prenorm_linear_ref(x, gamma, beta, w, b)
    assert out.shape == (B, N, D)
    # bf16 I/O + bf16 MXU operands -> loosened tolerance vs an all-f32 path.
    assert jnp.allclose(out.astype(jnp.float32), ref.astype(jnp.float32),
                        atol=2e-2, rtol=2e-2), "mismatch vs reference"

    print("KERNEL_OK")
</pallas_src>

<mosaic_0001>
module attributes {stable_mosaic.version = 11 : i64} {
  func.func @prenorm_linear_kernel(%arg0: i32, %arg1: i32, %arg2: memref<16x32xbf16, #tpu.memory_space<vmem>>, %arg3: memref<1x32xf32, #tpu.memory_space<vmem>>, %arg4: memref<1x32xf32, #tpu.memory_space<vmem>>, %arg5: memref<32x32xbf16, #tpu.memory_space<vmem>>, %arg6: memref<1x32xf32, #tpu.memory_space<vmem>>, %arg7: memref<16x32xbf16, #tpu.memory_space<vmem>>, %arg8: memref<16x32xbf16, #tpu.memory_space<vmem>>) attributes {dimension_semantics = [#tpu.dimension_semantics<parallel>, #tpu.dimension_semantics<arbitrary>], iteration_bounds = array<i64: 1, 1>, scalar_prefetch = 0 : i64, scratch_operands = 1 : i64, tpu.core_type = #tpu.core_type<tc>, window_params = [{transform_indices = @transform_0, window_bounds = array<i64: 16, 32>}, {pipeline_mode = #tpu.pipeline_mode<synchronous>, transform_indices = @transform_1, window_bounds = array<i64: 1, 32>}, {pipeline_mode = #tpu.pipeline_mode<synchronous>, transform_indices = @transform_2, window_bounds = array<i64: 1, 32>}, {pipeline_mode = #tpu.pipeline_mode<synchronous>, transform_indices = @transform_3, window_bounds = array<i64: 32, 32>}, {pipeline_mode = #tpu.pipeline_mode<synchronous>, transform_indices = @transform_4, window_bounds = array<i64: 1, 32>}, {transform_indices = @transform_5, window_bounds = array<i64: 16, 32>}]} {
    %c0_i32 = arith.constant 0 : i32
    %0 = arith.cmpi eq, %arg1, %c0_i32 : i32
    %1 = arith.extui %0 : i1 to i32
    %c0_i32_0 = arith.constant 0 : i32
    %2 = arith.cmpi ne, %1, %c0_i32_0 : i32
    scf.if %2 {
      %c0_8 = arith.constant 0 : index
      %c0_9 = arith.constant 0 : index
      %11 = vector.load %arg2[%c0_8, %c0_9] : memref<16x32xbf16, #tpu.memory_space<vmem>>, vector<16x32xbf16>
      %12 = arith.extf %11 : vector<16x32xbf16> to vector<16x32xf32>
      %cst_10 = arith.constant dense<0.000000e+00> : vector<16xf32>
      %13 = vector.multi_reduction <add>, %12, %cst_10 [1] : vector<16x32xf32> to vector<16xf32>
      %14 = vector.shape_cast %13 : vector<16xf32> to vector<16x1xf32>
      %cst_11 = arith.constant 3.200000e+01 : f32
      %15 = vector.broadcast %cst_11 : f32 to vector<16x1xf32>
      %16 = arith.divf %14, %15 : vector<16x1xf32>
      %17 = vector.broadcast %16 : vector<16x1xf32> to vector<16x32xf32>
      %18 = arith.subf %12, %17 : vector<16x32xf32>
      %19 = arith.mulf %18, %18 : vector<16x32xf32>
      %cst_12 = arith.constant dense<0.000000e+00> : vector<16xf32>
      %20 = vector.multi_reduction <add>, %19, %cst_12 [1] : vector<16x32xf32> to vector<16xf32>
      %21 = vector.shape_cast %20 : vector<16xf32> to vector<16x1xf32>
      %cst_13 = arith.constant 3.200000e+01 : f32
      %22 = vector.broadcast %cst_13 : f32 to vector<16x1xf32>
      %23 = arith.divf %21, %22 : vector<16x1xf32>
      %cst_14 = arith.constant 9.99999974E-6 : f32
      %24 = vector.broadcast %cst_14 : f32 to vector<16x1xf32>
      %25 = arith.addf %23, %24 : vector<16x1xf32>
      %26 = math.rsqrt %25 : vector<16x1xf32>
      %27 = vector.broadcast %26 : vector<16x1xf32> to vector<16x32xf32>
      %28 = arith.mulf %18, %27 : vector<16x32xf32>
      %c0_15 = arith.constant 0 : index
      %c0_16 = arith.constant 0 : index
      %29 = vector.load %arg3[%c0_15, %c0_16] : memref<1x32xf32, #tpu.memory_space<vmem>>, vector<1x32xf32>
      %30 = vector.broadcast %29 : vector<1x32xf32> to vector<16x32xf32>
      %31 = arith.mulf %28, %30 : vector<16x32xf32>
      %c0_17 = arith.constant 0 : index
      %c0_18 = arith.constant 0 : index
      %32 = vector.load %arg4[%c0_17, %c0_18] : memref<1x32xf32, #tpu.memory_space<vmem>>, vector<1x32xf32>
      %33 = vector.broadcast %32 : vector<1x32xf32> to vector<16x32xf32>
      %34 = arith.addf %31, %33 : vector<16x32xf32>
      %35 = arith.truncf %34 : vector<16x32xf32> to vector<16x32xbf16>
      %c0_19 = arith.constant 0 : index
      %c0_20 = arith.constant 0 : index
      %36 = vector.load %arg8[%c0_19, %c0_20] : memref<16x32xbf16, #tpu.memory_space<vmem>>, vector<16x32xbf16>
      tpu.vector_store %arg8[%c0_19, %c0_20], %35 {strides = array<i32>} : memref<16x32xbf16, #tpu.memory_space<vmem>>, vector<16x32xbf16>,
    } else {
    }
    %c0 = arith.constant 0 : index
    %c0_1 = arith.constant 0 : index
    %3 = vector.load %arg8[%c0, %c0_1] : memref<16x32xbf16, #tpu.memory_space<vmem>>, vector<16x32xbf16>
    %c0_2 = arith.constant 0 : index
    %c0_3 = arith.constant 0 : index
    %4 = vector.load %arg5[%c0_2, %c0_3] : memref<32x32xbf16, #tpu.memory_space<vmem>>, vector<32x32xbf16>
    %cst = arith.constant dense<0.000000e+00> : vector<16x32xf32>
    %5 = tpu.matmul %3, %4, %cst {dimension_numbers = #tpu.dot_dimension_numbers<[1], [0], [0], [1], [0, 0, 1, 1], [], []>} : vector<16x32xbf16>, vector<32x32xbf16>, vector<16x32xf32> -> vector<16x32xf32>
    %c0_4 = arith.constant 0 : index
    %c0_5 = arith.constant 0 : index
    %6 = vector.load %arg6[%c0_4, %c0_5] : memref<1x32xf32, #tpu.memory_space<vmem>>, vector<1x32xf32>
    %7 = vector.broadcast %6 : vector<1x32xf32> to vector<16x32xf32>
    %8 = arith.addf %5, %7 : vector<16x32xf32>
    %9 = arith.truncf %8 : vector<16x32xf32> to vector<16x32xbf16>
    %c0_6 = arith.constant 0 : index
    %c0_7 = arith.constant 0 : index
    %10 = vector.load %arg7[%c0_6, %c0_7] : memref<16x32xbf16, #tpu.memory_space<vmem>>, vector<16x32xbf16>
    tpu.vector_store %arg7[%c0_6, %c0_7], %9 {strides = array<i32>} : memref<16x32xbf16, #tpu.memory_space<vmem>>, vector<16x32xbf16>,
    return
  }
  func.func @transform_0(%arg0: i32, %arg1: i32) -> (i32, i32) {
    %c0_i32 = arith.constant 0 : i32
    %c0_i32_0 = arith.constant 0 : i32
    return %arg0, %c0_i32 : i32, i32
  }
  func.func @transform_1(%arg0: i32, %arg1: i32) -> (i32, i32) {
    %c0_i32 = arith.constant 0 : i32
    %c0_i32_0 = arith.constant 0 : i32
    %c0_i32_1 = arith.constant 0 : i32
    return %c0_i32, %c0_i32_0 : i32, i32
  }
  func.func @transform_2(%arg0: i32, %arg1: i32) -> (i32, i32) {
    %c0_i32 = arith.constant 0 : i32
    %c0_i32_0 = arith.constant 0 : i32
    %c0_i32_1 = arith.constant 0 : i32
    return %c0_i32, %c0_i32_0 : i32, i32
  }
  func.func @transform_3(%arg0: i32, %arg1: i32) -> (i32, i32) {
    %c0_i32 = arith.constant 0 : i32
    %c0_i32_0 = arith.constant 0 : i32
    return %c0_i32, %arg1 : i32, i32
  }
  func.func @transform_4(%arg0: i32, %arg1: i32) -> (i32, i32) {
    %c0_i32 = arith.constant 0 : i32
    %c0_i32_0 = arith.constant 0 : i32
    return %c0_i32, %arg1 : i32, i32
  }
  func.func @transform_5(%arg0: i32, %arg1: i32) -> (i32, i32) {
    %c0_i32 = arith.constant 0 : i32
    return %arg0, %arg1 : i32, i32
  }
}

</mosaic_0001>

<bundles_post_ra>
// kernel: tpu_custom_call.1
= control target key start
LH: loop header
LB: loop body
LE: loop exit
PB: predicated region body
PF: predicated region fallthrough
CT: control target
= control target key end

     0   :  { %10 = vsyncpa [#allocation4], 0  ;;  %s411_s0 = inlined_call_operand.hbm [shape: bf16[16,32], index: 0, kind: input, shape index: {}]   ;;  %s412_s1 = inlined_call_operand.vmem [shape: f32[1,32], index: 1, kind: input, shape index: {}]   ;;  %s413_s2 = inlined_call_operand.vmem [shape: f32[1,32], index: 2, kind: input, shape index: {}]   ;;  %s414_s3 = inlined_call_operand.hbm [shape: bf16[32,32], index: 3, kind: input, shape index: {}]   ;;  %s415_s4 = inlined_call_operand.vmem [shape: f32[1,32], index: 4, kind: input, shape index: {}]   ;;  %s416_s5 = inlined_call_operand.hbm [shape: bf16[16,32], index: 5, kind: output, shape index: {}]  }
   0x1   :  { %11 = vsyncpa [#allocation7], 0 }
   0x2   :  { %12 = vsyncpa [#allocation5], 0  ;;  %s314_s18 = smov [#allocation3]   ;;  %s242_s22 = scalar_lea.hbm %s411_s0, 128 }
   0x3   :  { %s18_s19 = sshll.u32 %s314_s18, 4  ;;  %p243_p0 = scmp.ne.s32.totalorder %s411_s0, %s242_s22  ;;  %s19_s19 = int_to_ptr.vmem [resolvable:$true] %s18_s19 }
   0x4   :  { %p246_p1 = scmp.lt.u32.totalorder %s242_s22, %s411_s0 }
   0x6   :  { %p248_p2 = pnand %p246_p1, %p243_p0 }
   0x8   :  { %251 = shalt.err (!%p248_p2)
}
   0x9   :  { %s252_s27 = scalar_lea.vmem %s19_s19, 128  ;;  %p257_p4 = scmp.lt.s32.totalorder %s19_s19, %s19_s19 }
   0xa   :  { %p253_p3 = scmp.ne.s32.totalorder %s19_s19, %s252_s27  ;;  %p258_p5 = scmp.lt.s32.totalorder %s252_s27, %s252_s27 }
   0xc   :  { %p259_p6 = por %p258_p5, %p257_p4 }
   0xe   :  { %p260_p7 = pnand %p259_p6, %p253_p3 }
  0x10   :  { %263 = shalt.err (!%p260_p7)
}
  0x11   :  { %s315_s28 = smov 64   ;;  %s316_s29 = smov 4  }
  0x12   :  { %24 = dma.hbm_to_vmem [thread:$0]  %s411_s0, 128, %s19_s19, [#allocation4], %s315_s28, %s315_s28, %s316_s29  }
  0x13   :  { %s317_s7 = smov [#allocation6]   ;;  %s264_s11 = scalar_lea.hbm %s414_s3, 256 }
  0x14   :  { %s34_s8 = sshll.u32 %s317_s7, 4  ;;  %p265_p8 = scmp.ne.s32.totalorder %s414_s3, %s264_s11  ;;  %s35_s8 = int_to_ptr.vmem [resolvable:$true] %s34_s8 }
  0x15   :  { %p268_p9 = scmp.lt.u32.totalorder %s264_s11, %s414_s3 }
  0x17   :  { %p270_p10 = pnand %p268_p9, %p265_p8 }
  0x19   :  { %273 = shalt.err (!%p270_p10)
}
  0x1a   :  { %s274_s16 = scalar_lea.vmem %s35_s8, 256  ;;  %p279_p12 = scmp.lt.s32.totalorder %s35_s8, %s35_s8 }
  0x1b   :  { %p275_p11 = scmp.ne.s32.totalorder %s35_s8, %s274_s16  ;;  %p280_p13 = scmp.lt.s32.totalorder %s274_s16, %s274_s16 }
  0x1d   :  { %p281_p0 = por %p280_p13, %p279_p12 }
  0x1f   :  { %p282_p1 = pnand %p281_p0, %p275_p11 }
  0x21   :  { %285 = shalt.err (!%p282_p1)
}
  0x22   :  { %40 = dma.hbm_to_vmem [thread:$0]  %s414_s3, 256, %s35_s8, [#allocation7], %s315_s28, %s315_s28, %s316_s29  }
  0x23   :  { %308 = dma.done.wait [#allocation4], 128  }
  0x24   :  { %309 = vsyncadd [#allocation4], 4294967168 }
  0x25   :  { %310 = dma.done.wait [#allocation7], 256  }
  0x26   :  { %311 = vsyncadd [#allocation7], 4294967040  ;;  %v215_v0 = vld [vmem:[#allocation3] sm:$0xff]   ;;  %vm58_vm0 = vcmask 261120   ;;  %v236_v15 = vld [vmem:[#allocation6] sm:$0xff]   ;;  %v318_v16 = vmov 0.0  }
  0x27   :  { %v216_v1 = vunpack.c.l.bf16 %v215_v0  ;;  %v217_v2 = vunpack.c.h.bf16 %v215_v0  ;;  %221 = vmatprep.subr.bf16.mxu0 %v318_v16  ;;  %v237_v17 = vld [vmem:[#allocation6 + $0x8] sm:$0xff]   ;;  %vm319_vm1 = vmmov 0   ;;  %v204_v26 = vld [vmem:[%s412_s1] ss:$0 sm:$0xff]  ;;  %vm183_vm2 = vcmask 257024   ;;  %s320_s1 = smov [#allocation8]  }
  0x28   :  { %222 = vmatpush3.bf16.msra.mxu0 %v236_v15  ;;  %225 = vmatprep.mubr.msk.bf16.mxu0 %vm319_vm1, %v318_v16  ;;  %v205_v30 = vld [vmem:[%s413_s2] ss:$0 sm:$0xff]  ;;  %s191_s2 = sshll.u32 %s320_s1, 4  ;;  %s192_s2 = int_to_ptr.vmem [resolvable:$true] %s191_s2 }
  0x29   :  { %v59_v3 = vsel %vm58_vm0, %v216_v1, 0.0  ;;  %v62_v4 = vsel %vm58_vm0, %v217_v2, 0.0  ;;  %223 = vmatprep.subr.bf16.mxu0 %v318_v16  ;;  %v206_v36 = vld [vmem:[%s415_s4] ss:$0 sm:$0xff]  ;;  %s286_s23 = scalar_lea.vmem %s192_s2, 128  ;;  %p291_p3 = scmp.lt.s32.totalorder %s192_s2, %s192_s2 }
  0x2a   :  { %60 = vadd.xlane.f32.xlu0 %v59_v3  ;;  %p287_p2 = scmp.ne.s32.totalorder %s192_s2, %s286_s23  ;;  %p292_p4 = scmp.lt.s32.totalorder %s286_s23, %s286_s23 }
  0x2c   :  { %224 = vmatpush3.bf16.msra.mxu0 %v237_v17  ;;  %p293_p5 = por %p292_p4, %p291_p3 }
  0x2e   :  { %63 = vadd.xlane.f32.xlu0 %v62_v4  ;;  %p294_p6 = pnand %p293_p5, %p287_p2 }
  0xb7   :  { %v61_v5 = vpop.xlane.xlu0 %60 }
  0xb8   :  { %v66_v6 = vmul.f32 0.03125, %v61_v5 }
  0xba   :  { %v68_v7 = vsub.f32 %v216_v1, %v66_v6 }
  0xbb   :  { %v64_v8 = vpop.xlane.xlu0 %63 }
  0xbc   :  { %v67_v9 = vmul.f32 0.03125, %v64_v8  ;;  %v70_v10 = vmul.f32 %v68_v7, %v68_v7 }
  0xbe   :  { %v69_v11 = vsub.f32 %v217_v2, %v67_v9  ;;  %v72_v12 = vsel %vm58_vm0, %v70_v10, 0.0 }
  0xbf   :  { %73 = vadd.xlane.f32.xlu1 %v72_v12 }
  0xc0   :  { %v71_v13 = vmul.f32 %v69_v11, %v69_v11 }
  0xc2   :  { %v75_v14 = vsel %vm58_vm0, %v71_v13, 0.0 }
  0xc3   :  { %76 = vadd.xlane.f32.xlu1 %v75_v14 }
 0x14c   :  { %v74_v18 = vpop.xlane.xlu1 %73 }
 0x14d   :  { %v78_v19 = vmul.f32 0.03125, %v74_v18 }
 0x14f   :  { %v80_v20 = vadd.f32 1e-05, %v78_v19 }
 0x150   :  { %v77_v21 = vpop.xlane.xlu1 %76 }
 0x151   :  { %238 = vrsqrt.f32 %v80_v20  ;;  %v79_v22 = vmul.f32 0.03125, %v77_v21 }
 0x153   :  { %v81_v23 = vadd.f32 1e-05, %v79_v22 }
 0x155   :  { %240 = vrsqrt.f32 %v81_v23 }
 0x15b   :  { %v239_v24 = vpop.eup %238 }
 0x15c   :  { %v84_v25 = vmul.f32 %v239_v24, %v68_v7 }
 0x15e   :  { %v93_v28 = vmul.f32 %v204_v26, %v84_v25 }
 0x15f   :  { %v241_v27 = vpop.eup %240 }
 0x160   :  { %v85_v29 = vmul.f32 %v241_v27, %v69_v11  ;;  %v102_v32 = vadd.f32 %v205_v30, %v93_v28 }
 0x162   :  { %v94_v31 = vmul.f32 %v204_v26, %v85_v29 }
 0x164   :  { %v103_v33 = vadd.f32 %v205_v30, %v94_v31 }
 0x166   :  { %v104_v34 = vpack.c.bf16 %v103_v33, %v102_v32 }
 0x168   :  { %105 = vst.msk [vmem:[#allocation2] sm:$0xff] %vm58_vm0, %v104_v34 }
 0x16f   :  { %v106_v35 = vld [vmem:[#allocation2] sm:$0xff] }
 0x170   :  { %226 = vmatmul.mubr.msk.bf16.vlgmr.msra.gmra.mrb[0].mxu0 %vm58_vm0, %v106_v35 }
 0x243   :  { %v168_v37 = vpop.f32.mrb[0].mxu0 }
 0x244   :  { %v169_v38 = vadd.f32 %v206_v36, %v168_v37  ;;  %v227_v39 = vpop.f32.mrb[1].mxu0 }
 0x245   :  { %v171_v40 = vpop.f32.mrb[2].mxu0 }
 0x246   :  { %v212_v41 = vpack.c.bf16 %v169_v38, %v169_v38  ;;  %v172_v42 = vadd.f32 %v206_v36, %v171_v40  ;;  %v228_v43 = vpop.f32.mrb[3].mxu0 }
 0x248   :  { %v213_v44 = vpack.c.bf16 %v172_v42, %v172_v42  ;;  %184 = vst.msk [vmem:[#allocation8] sm:$0xf] %vm183_vm2, %v212_v41 }
 0x24a   :  { %185 = vst.msk [vmem:[#allocation8 + $0x4] sm:$0xf] %vm183_vm2, %v213_v44 }
 0x24b   :  { %297 = shalt.err (!%p294_p6)
}
 0x24c   :  { %s298_s25 = scalar_lea.hbm %s416_s5, 128 }
 0x24d   :  { %p299_p7 = scmp.ne.s32.totalorder %s416_s5, %s298_s25  ;;  %p302_p8 = scmp.lt.u32.totalorder %s298_s25, %s416_s5 }
 0x24f   :  { %p304_p9 = pnand %p302_p8, %p299_p7 }
 0x251   :  { %307 = shalt.err (!%p304_p9)
}
 0x252   :  { %197 = dma.vmem_to_hbm [thread:$0]  %s192_s2, 128, %s416_s5, [#allocation5], %s315_s28, %s315_s28, %s316_s29  }
 0x253   :  { %312 = dma.done.wait [#allocation5], 128  }
 0x254   :  { %313 = vsyncadd [#allocation5], 4294967168 }
 0x255   :  { %201 = vsyncpa [#allocation4], 1 }
 0x256   :  { %202 = vsyncpa [#allocation7], 1 }
 0x257   :  { %203 = vsyncpa [#allocation5], 1 }

</bundles_post_ra>
